<compile_context>
chip_gen: v7x
topology: tpu7x:2x2x1
jax: 0.10.0
libtpu: 0.0.40
codegen_flags: <defaults>
</compile_context>

<pallas_src>
import jax
import jax.numpy as jnp
from jax.experimental import pallas as pl
from jax.experimental.pallas import tpu as pltpu


TILE_P_MAX = 1024  # packed rows per grid step (~1.3 MiB bf16 input buffer)


def _round_up(x, m):
    return (x + m - 1) // m * m


# ----------------------------- Pallas kernel ------------------------------
def patch_embed_kernel(x_ref, w_ref, a_ref, p_ref, o_ref):
    # x_ref: (tile_p, Kp) bf16  packed im2col rows (`pack` logical rows each)
    # w_ref: (Kp, Np)     bf16  block-diagonal conv weight (grid-invariant)
    # a_ref: (Np, Np)     f32   block-diagonal group-averaging matrix
    # p_ref: (3, Np)      f32   [conv bias; ln gamma; ln beta], lane-packed
    # o_ref: (tile_p, Np) f32
    y = jnp.dot(x_ref[...], w_ref[...], preferred_element_type=jnp.float32)  # MXU
    y = y + p_ref[0:1, :]
    # LayerNorm per logical row (= per N-lane group).  The averaging matmul
    # both reduces within each lane group and broadcasts the statistic back to
    # every lane of that group, so everything stays elementwise afterwards.
    # Two-pass variance, f32 math (required on v5e: no bf16 VPU/EUP), eps=1e-5.
    mean = jnp.dot(y, a_ref[...], precision=jax.lax.Precision.HIGHEST,
                   preferred_element_type=jnp.float32)
    d = y - mean
    var = jnp.dot(d * d, a_ref[...], precision=jax.lax.Precision.HIGHEST,
                  preferred_element_type=jnp.float32)
    scale = p_ref[1:2, :] * jax.lax.rsqrt(var + 1e-5)
    o_ref[...] = (d * scale + p_ref[2:3, :]).astype(o_ref.dtype)


# ------------------------------ JAX wrapper -------------------------------
def _extract_patches(x_nchw, kernel=7, stride=4, pad=2):
    """im2col via XLA's patch-extraction conv. x: (B, C, H, W) -> (B*L, C*k*k).

    Feature ordering of the K axis is (c, kh, kw) (channel-major), matching
    PyTorch's conv_w.reshape(embed_dim, C*k*k).
    """
    B, C, H, W = x_nchw.shape
    Hout = (H + 2 * pad - kernel) // stride + 1
    Wout = (W + 2 * pad - kernel) // stride + 1
    patches = jax.lax.conv_general_dilated_patches(
        x_nchw,
        filter_shape=(kernel, kernel),
        window_strides=(stride, stride),
        padding=((pad, pad), (pad, pad)),
        dimension_numbers=("NCHW", "OIHW", "NHWC"),
    )  # (B, Hout, Wout, C*k*k) -- free reshape to (M, K)
    K = C * kernel * kernel
    return patches.reshape(B * Hout * Wout, K), Hout, Wout


def _patch_embed_matmul_ln(cols, conv_w, conv_b, ln_g, ln_b):
    """cols: (M, K) bf16 -> (M, embed_dim) f32 (matmul + bias + LayerNorm)."""
    M, K = cols.shape
    N = conv_w.shape[0]

    # Lane-packing factor: process `pack` logical rows per physical 128-lane row.
    if N <= 128 and 128 % N == 0 and M % (128 // N) == 0:
        pack = 128 // N
    else:
        pack = 1  # e.g. embed_dim=80: fall back to masked (partial-lane) stores
    Kp, Np, Mp = pack * K, pack * N, M // pack

    # Block-diagonal conv weight: W_block[a*K+k, b*N+n] = W[k,n] if a==b else 0.
    w_mat = conv_w.reshape(N, K).T.astype(jnp.float32)                   # (K, N)
    eye = jnp.eye(pack, dtype=jnp.float32)
    w_block = jnp.einsum("ab,kn->akbn", eye, w_mat).reshape(Kp, Np)
    w_block = w_block.astype(jnp.bfloat16)
    # Block-diagonal group-averaging matrix (each N-lane group averaged, then
    # broadcast back across its own lanes).
    avg = jnp.kron(eye, jnp.ones((N, N), jnp.float32)) / N               # (Np, Np)
    params_row = jnp.stack([
        jnp.tile(conv_b.astype(jnp.float32), pack),
        jnp.tile(ln_g.astype(jnp.float32), pack),
        jnp.tile(ln_b.astype(jnp.float32), pack),
    ])                                                                   # (3, Np)

    cols_p = cols.reshape(Mp, Kp)   # free row-major view, no copy

    # Tile the packed M axis: aim for >=4 grid steps (v7x: 2 TensorCores +
    # pipeline depth), sublane-aligned, capped for VMEM headroom on all gens.
    tile_p = min(TILE_P_MAX,
                 max(8, _round_up(pl.cdiv(Mp, 4), 8)),
                 _round_up(Mp, 8))
    grid = (pl.cdiv(Mp, tile_p),)   # ragged last block handled by Pallas

    out = pl.pallas_call(
        patch_embed_kernel,
        out_shape=jax.ShapeDtypeStruct((Mp, Np), jnp.float32),
        grid=grid,
        in_specs=[
            # Streamed, double-buffered patch rows.
            # TODO(synk): pipeline_mode=pl.Buffered(3) here is a nearly-free
            # smoothing win on v5e once validated on hardware.
            pl.BlockSpec((tile_p, Kp), lambda i: (i, 0)),
            pl.BlockSpec((Kp, Np), lambda i: (0, 0)),   # resident weight
            pl.BlockSpec((Np, Np), lambda i: (0, 0)),   # resident avg matrix
            pl.BlockSpec((3, Np), lambda i: (0, 0)),    # bias / gamma / beta
        ],
        out_specs=pl.BlockSpec((tile_p, Np), lambda i: (i, 0)),
        compiler_params=pltpu.CompilerParams(
            # M tiles are independent -> shard across TensorCores on v7x.
            dimension_semantics=("parallel",)),
    )(cols_p, w_block, avg, params_row)

    return out.reshape(M, N)        # free unpack of the lane-packed rows


def dqa_forward(rgb, depth, params):
    """Mirrors DQA.forward: the same shared `patches` module applied to both.

    rgb and depth are fused into one batch -> one patch extraction and one
    pallas_call (weights loaded once, longer pipeline hides DMA pro/epilogue).
    bf16 inputs to the matmul (vs f32 reference) are the main accuracy delta.
    """
    conv_w, conv_b, ln_g, ln_b = params
    b_rgb = rgb.shape[0]
    x = jnp.concatenate([rgb.astype(jnp.bfloat16), depth.astype(jnp.bfloat16)],
                        axis=0)
    cols, hout, wout = _extract_patches(x)
    out2d = _patch_embed_matmul_ln(cols, conv_w, conv_b, ln_g, ln_b)
    L = hout * wout
    embed_dim = conv_w.shape[0]
    out = out2d.reshape(x.shape[0], L, embed_dim)
    return out[:b_rgb], out[b_rgb:]


# --------------------------- pure-JAX reference ---------------------------
def _reference_forward(rgb, depth, params):
    conv_w, conv_b, ln_g, ln_b = params

    def one(x):
        y = jax.lax.conv_general_dilated(
            x, conv_w, window_strides=(4, 4), padding=((2, 2), (2, 2)),
            dimension_numbers=("NCHW", "OIHW", "NCHW"),
            precision=jax.lax.Precision.HIGHEST)
        y = y + conv_b[None, :, None, None]
        B, C, H, W = y.shape
        y = y.transpose(0, 2, 3, 1).reshape(B, H * W, C)
        mean = y.mean(-1, keepdims=True)
        var = ((y - mean) ** 2).mean(-1, keepdims=True)
        return (y - mean) / jnp.sqrt(var + 1e-5) * ln_g + ln_b

    return one(rgb), one(depth)


# --------------------------------- main -----------------------------------
if __name__ == "__main__":
    # Small config consistent with the module: img_size=16 -> 4x4 = 16 patches.
    in_chans, embed_dim, img_size, batch = 3, 32, 16, 2

    key = jax.random.PRNGKey(0)
    k_w, k_b, k_rgb, k_depth = jax.random.split(key, 4)

    conv_w = jax.random.normal(k_w, (embed_dim, in_chans, 7, 7), jnp.float32) * 0.02
    conv_b = jax.random.normal(k_b, (embed_dim,), jnp.float32) * 0.02
    ln_g = jnp.ones((embed_dim,), jnp.float32)
    ln_b = jnp.zeros((embed_dim,), jnp.float32)
    params = (conv_w, conv_b, ln_g, ln_b)

    rgb = jax.random.normal(k_rgb, (batch, in_chans, img_size, img_size), jnp.float32)
    depth = jax.random.normal(k_depth, (batch, in_chans, img_size, img_size), jnp.float32)

    fwd = jax.jit(dqa_forward)
    rgb_out, depth_out = fwd(rgb, depth, params)
    jax.block_until_ready((rgb_out, depth_out))

    L = (img_size // 4) ** 2
    assert rgb_out.shape == (batch, L, embed_dim), rgb_out.shape
    assert depth_out.shape == (batch, L, embed_dim), depth_out.shape

    # Correctness vs. a pure-JAX f32 reference (bf16 matmul -> loose tolerance).
    rgb_ref, depth_ref = _reference_forward(rgb, depth, params)
    err = max(float(jnp.max(jnp.abs(rgb_out - rgb_ref))),
              float(jnp.max(jnp.abs(depth_out - depth_ref))))
    assert err < 8e-2, f"max abs error {err}"

    print("KERNEL_OK")
</pallas_src>

<mosaic_0001>
module attributes {stable_mosaic.version = 11 : i64} {
  func.func @patch_embed_kernel(%arg0: i32, %arg1: memref<8x588xbf16, #tpu.memory_space<vmem>>, %arg2: memref<588x128xbf16, #tpu.memory_space<vmem>>, %arg3: memref<128x128xf32, #tpu.memory_space<vmem>>, %arg4: memref<3x128xf32, #tpu.memory_space<vmem>>, %arg5: memref<8x128xf32, #tpu.memory_space<vmem>>) attributes {dimension_semantics = [#tpu.dimension_semantics<parallel>], iteration_bounds = array<i64: 2>, scalar_prefetch = 0 : i64, scratch_operands = 0 : i64, tpu.core_type = #tpu.core_type<tc>, window_params = [{transform_indices = @transform_0, window_bounds = array<i64: 8, 588>}, {pipeline_mode = #tpu.pipeline_mode<synchronous>, transform_indices = @transform_1, window_bounds = array<i64: 588, 128>}, {pipeline_mode = #tpu.pipeline_mode<synchronous>, transform_indices = @transform_2, window_bounds = array<i64: 128, 128>}, {pipeline_mode = #tpu.pipeline_mode<synchronous>, transform_indices = @transform_3, window_bounds = array<i64: 3, 128>}, {transform_indices = @transform_4, window_bounds = array<i64: 8, 128>}]} {
    %c0 = arith.constant 0 : index
    %c0_0 = arith.constant 0 : index
    %0 = vector.load %arg1[%c0, %c0_0] : memref<8x588xbf16, #tpu.memory_space<vmem>>, vector<8x588xbf16>
    %c0_1 = arith.constant 0 : index
    %c0_2 = arith.constant 0 : index
    %1 = vector.load %arg2[%c0_1, %c0_2] : memref<588x128xbf16, #tpu.memory_space<vmem>>, vector<588x128xbf16>
    %cst = arith.constant dense<0.000000e+00> : vector<8x128xf32>
    %2 = tpu.matmul %0, %1, %cst {dimension_numbers = #tpu.dot_dimension_numbers<[1], [0], [0], [1], [0, 0, 1, 1], [], []>} : vector<8x588xbf16>, vector<588x128xbf16>, vector<8x128xf32> -> vector<8x128xf32>
    %c0_3 = arith.constant 0 : index
    %c0_4 = arith.constant 0 : index
    %3 = vector.load %arg4[%c0_3, %c0_4] : memref<3x128xf32, #tpu.memory_space<vmem>>, vector<1x128xf32>
    %4 = vector.broadcast %3 : vector<1x128xf32> to vector<8x128xf32>
    %5 = arith.addf %2, %4 : vector<8x128xf32>
    %c0_5 = arith.constant 0 : index
    %c0_6 = arith.constant 0 : index
    %6 = vector.load %arg3[%c0_5, %c0_6] : memref<128x128xf32, #tpu.memory_space<vmem>>, vector<128x128xf32>
    %cst_7 = arith.constant dense<0.000000e+00> : vector<8x128xf32>
    %7 = tpu.matmul %5, %6, %cst_7 {dimension_numbers = #tpu.dot_dimension_numbers<[1], [0], [0], [1], [0, 0, 1, 1], [], []>, precision = #tpu.contract_precision<fp32>} : vector<8x128xf32>, vector<128x128xf32>, vector<8x128xf32> -> vector<8x128xf32>
    %8 = arith.subf %5, %7 : vector<8x128xf32>
    %9 = arith.mulf %8, %8 : vector<8x128xf32>
    %c0_8 = arith.constant 0 : index
    %c0_9 = arith.constant 0 : index
    %10 = vector.load %arg3[%c0_8, %c0_9] : memref<128x128xf32, #tpu.memory_space<vmem>>, vector<128x128xf32>
    %cst_10 = arith.constant dense<0.000000e+00> : vector<8x128xf32>
    %11 = tpu.matmul %9, %10, %cst_10 {dimension_numbers = #tpu.dot_dimension_numbers<[1], [0], [0], [1], [0, 0, 1, 1], [], []>, precision = #tpu.contract_precision<fp32>} : vector<8x128xf32>, vector<128x128xf32>, vector<8x128xf32> -> vector<8x128xf32>
    %c1 = arith.constant 1 : index
    %c0_11 = arith.constant 0 : index
    %12 = vector.load %arg4[%c1, %c0_11] : memref<3x128xf32, #tpu.memory_space<vmem>>, vector<1x128xf32>
    %cst_12 = arith.constant 9.99999974E-6 : f32
    %13 = vector.broadcast %cst_12 : f32 to vector<8x128xf32>
    %14 = arith.addf %11, %13 : vector<8x128xf32>
    %15 = math.rsqrt %14 : vector<8x128xf32>
    %16 = vector.broadcast %12 : vector<1x128xf32> to vector<8x128xf32>
    %17 = arith.mulf %16, %15 : vector<8x128xf32>
    %18 = arith.mulf %8, %17 : vector<8x128xf32>
    %c2 = arith.constant 2 : index
    %c0_13 = arith.constant 0 : index
    %19 = vector.load %arg4[%c2, %c0_13] : memref<3x128xf32, #tpu.memory_space<vmem>>, vector<1x128xf32>
    %20 = vector.broadcast %19 : vector<1x128xf32> to vector<8x128xf32>
    %21 = arith.addf %18, %20 : vector<8x128xf32>
    %c0_14 = arith.constant 0 : index
    %c0_15 = arith.constant 0 : index
    %22 = vector.load %arg5[%c0_14, %c0_15] : memref<8x128xf32, #tpu.memory_space<vmem>>, vector<8x128xf32>
    tpu.vector_store %arg5[%c0_14, %c0_15], %21 {strides = array<i32>} : memref<8x128xf32, #tpu.memory_space<vmem>>, vector<8x128xf32>,
    return
  }
  func.func @transform_0(%arg0: i32) -> (i32, i32) {
    %c0_i32 = arith.constant 0 : i32
    %c0_i32_0 = arith.constant 0 : i32
    return %arg0, %c0_i32 : i32, i32
  }
  func.func @transform_1(%arg0: i32) -> (i32, i32) {
    %c0_i32 = arith.constant 0 : i32
    %c0_i32_0 = arith.constant 0 : i32
    %c0_i32_1 = arith.constant 0 : i32
    return %c0_i32, %c0_i32_0 : i32, i32
  }
  func.func @transform_2(%arg0: i32) -> (i32, i32) {
    %c0_i32 = arith.constant 0 : i32
    %c0_i32_0 = arith.constant 0 : i32
    %c0_i32_1 = arith.constant 0 : i32
    return %c0_i32, %c0_i32_0 : i32, i32
  }
  func.func @transform_3(%arg0: i32) -> (i32, i32) {
    %c0_i32 = arith.constant 0 : i32
    %c0_i32_0 = arith.constant 0 : i32
    %c0_i32_1 = arith.constant 0 : i32
    return %c0_i32, %c0_i32_0 : i32, i32
  }
  func.func @transform_4(%arg0: i32) -> (i32, i32) {
    %c0_i32 = arith.constant 0 : i32
    %c0_i32_0 = arith.constant 0 : i32
    return %arg0, %c0_i32 : i32, i32
  }
}

</mosaic_0001>

<bundles_post_ra>
// kernel: tile.18
= control target key start
LH: loop header
LB: loop body
LE: loop exit
PB: predicated region body
PF: predicated region fallthrough
CT: control target
= control target key end

     0   :  { %s22_s0 = inlined_call_operand.vmem [shape: f32[32], index: 0, kind: input, shape index: {}]   ;;  %s23_s1 = inlined_call_operand.vmem [shape: f32[4,32], index: 1, kind: output, shape index: {}]  }
   0x1   :  { %v4_v0 = vld [vmem:[%s22_s0] ss:$0 sm:$0xff] }
   0x2   :  { %5 = vst [vmem:[%s23_s1] sm:$0xf] %v4_v0 }

// kernel: tile.27
= control target key start
LH: loop header
LB: loop body
LE: loop exit
PB: predicated region body
PF: predicated region fallthrough
CT: control target
= control target key end

     0   :  { %vm7_vm0 = vcmask 261120   ;;  %s37_s8 = smov 32   ;;  %s38_s9 = smov 64   ;;  %vm13_vm1 = vcmask 1048320   ;;  %vm19_vm2 = vcmask 785920   ;;  %vm25_vm3 = vcmask 523520   ;;  %s55_s0 = inlined_call_operand.vmem [shape: f32[4,32], index: 0, kind: input, shape index: {}]   ;;  %s56_s1 = inlined_call_operand.vmem [shape: f32[1,128], index: 1, kind: output, shape index: {}]  }
   0x1   :  { %v4_v0 = vld [vmem:[%s55_s0] sm:$0xf]  ;;  %s36_s0 = smov 96  }
   0x2   :  { %5 = vst [vmem:[#allocation1] sm:$0xf] %v4_v0 }
   0x9   :  { %v10_v1 = vld [vmem:[#allocation1 + $0x3] sm:$0x1]   ;;  %v22_v2 = vld [vmem:[#allocation1 + $0x1] sm:$0x1]   ;;  %v6_v3 = vld [vmem:[#allocation1] sm:$0x1]  }
   0xa   :  { %11 = vrot.lane.b32.xlu0 %v10_v1, %s36_s0  ;;  %23 = vrot.lane.b32.xlu1 %v22_v2, %s37_s8  ;;  %v16_v4 = vld [vmem:[#allocation1 + $0x2] sm:$0x1]   ;;  %8 = vst.msk [vmem:[#allocation0] sm:$0x1] %vm7_vm0, %v6_v3  }
   0xe   :  { %17 = vrot.lane.b32.xlu0 %v16_v4, %s38_s9 }
  0x7c   :  { %v12_v5 = vpop.permute.xlu0 %11   ;;  %v24_v6 = vpop.permute.xlu1 %23  }
  0x7d   :  { %14 = vst.msk [vmem:[#allocation0] sm:$0x1] %vm13_vm1, %v12_v5  }
  0x80   :  { %v18_v7 = vpop.permute.xlu0 %17  }
  0x81   :  { %20 = vst.msk [vmem:[#allocation0] sm:$0x1] %vm19_vm2, %v18_v7  }
  0x82   :  { %26 = vst.msk [vmem:[#allocation0] sm:$0x1] %vm25_vm3, %v24_v6  }
  0x89   :  { %v30_v8 = vld [vmem:[#allocation0] sm:$0x1] }
  0x8a   :  { %32 = vst [vmem:[%s56_s1] sm:$0x1] %v30_v8 }

// kernel: dqa_forward.1
= control target key start
LH: loop header
LB: loop body
LE: loop exit
PB: predicated region body
PF: predicated region fallthrough
CT: control target
= control target key end

     0   :  { %s3157_s15 = smov 0   ;;  %s3920_s0 = inlined_call_operand.vmem [shape: bf16[16,588], index: 0, kind: input, shape index: {}]   ;;  %s3921_s1 = inlined_call_operand.vmem [shape: bf16[588,128], index: 1, kind: input, shape index: {}]   ;;  %s3922_s2 = inlined_call_operand.vmem [shape: f32[128,128], index: 2, kind: input, shape index: {}]   ;;  %s3923_s3 = inlined_call_operand.vmem [shape: f32[3,128], index: 3, kind: input, shape index: {}]   ;;  %s3924_s4 = inlined_call_operand.vmem [shape: f32[16,128], index: 4, kind: output, shape index: {}]  }
   0x1 LB: > { %s2013_s16 = sadd.s32 4294967295, %s3127_s15   ;;  %p2017_p0 = scmp.ge.s32.totalorder %s3127_s15, 1  ;;  %s3127_s15 = sphi %s3157_s15, %s14_s15  }
   0x2   : > { %p162_p1 = scmp.lt.s32.totalorder %s3127_s15, 3 }
   0x4   : > { %p163_p2 = pnand %p2017_p0, %p162_p1 }
   0x5   : > { %v3077_v0 = vld [vmem:[%s3921_s1 + $0x40] sm:$0xff] (!%p163_p2)   ;;  %v3081_v4 = vld [vmem:[%s3921_s1 + $0x48] sm:$0xff] (!%p163_p2)   ;;  %v3085_v8 = vld [vmem:[%s3921_s1 + $0x50] sm:$0xff] (!%p163_p2)   ;;  %p187_p3 = scmp.lt.s32.totalorder (!%p163_p2), %s2013_s16, 1  ;;  %v3129_v35 = vmov (!%p163_p2), 0.0   ;;  %vm3130_vm0 = vmmov (!%p163_p2), 0  }
   0x6   : > { %166 = sbr.rel (%p163_p2) target bundleno = 1060 (0x424), region = 36  ;;  %v3078_v1 = vld [vmem:[%s3921_s1] sm:$0xff] (!%p163_p2)   ;;  %2068 = vmatprep.subr.bf16.mxu0 (!%p163_p2), %v3077_v0  ;;  %v3082_v5 = vld [vmem:[%s3921_s1 + $0x8] sm:$0xff] (!%p163_p2)   ;;  %v3086_v9 = vld [vmem:[%s3921_s1 + $0x10] sm:$0xff] (!%p163_p2)   ;;  %vm521_vm1 = vcmask (!%p163_p2), 1045504   ;;  %vm517_vm2 = vcmask (!%p163_p2), 621568  }
   0x7   : > { %v3079_v2 = vld [vmem:[%s3921_s1 + $0xc0] sm:$0xff] (!%p163_p2)   ;;  %2069 = vmatpush3.bf16.msra.mxu0 (!%p163_p2), %v3078_v1  ;;  %v3083_v6 = vld [vmem:[%s3921_s1 + $0xc8] sm:$0xff] (!%p163_p2)   ;;  %v3087_v10 = vld [vmem:[%s3921_s1 + $0xd0] sm:$0xff] (!%p163_p2)   ;;  %v3131_v51 = vmov (!%p163_p2), 0.0|0.0  }
   0x8   : > { %v3080_v3 = vld [vmem:[%s3921_s1 + $0x80] sm:$0xff] (!%p163_p2)   ;;  %2090 = vmatprep.subr.bf16.mxu1 (!%p163_p2), %v3079_v2  ;;  %2070 = vmatprep.subr.bf16.mxu0 (!%p163_p2), %v3081_v4  ;;  %v3084_v7 = vld [vmem:[%s3921_s1 + $0x88] sm:$0xff] (!%p163_p2)   ;;  %v3088_v11 = vld [vmem:[%s3921_s1 + $0x90] sm:$0xff] (!%p163_p2)  }
   0x9   : > { %2091 = vmatpush3.bf16.msra.mxu1 (!%p163_p2), %v3080_v3  ;;  %v3089_v12 = vld [vmem:[%s3921_s1 + $0x58] sm:$0xff] (!%p163_p2)   ;;  %v3093_v16 = vld [vmem:[%s3921_s1 + $0x60] sm:$0xff] (!%p163_p2)   ;;  %v3097_v20 = vld [vmem:[%s3921_s1 + $0x68] sm:$0xff] (!%p163_p2)  }
   0xa   : > { %2092 = vmatprep.subr.bf16.mxu1 (!%p163_p2), %v3083_v6  ;;  %v3090_v13 = vld [vmem:[%s3921_s1 + $0x18] sm:$0xff] (!%p163_p2)   ;;  %v3094_v17 = vld [vmem:[%s3921_s1 + $0x20] sm:$0xff] (!%p163_p2)   ;;  %v3098_v21 = vld [vmem:[%s3921_s1 + $0x28] sm:$0xff] (!%p163_p2)  }
   0xb   : > { %2071 = vmatpush3.bf16.msra.mxu0 (!%p163_p2), %v3082_v5  ;;  %v3091_v14 = vld [vmem:[%s3921_s1 + $0xd8] sm:$0xff] (!%p163_p2)   ;;  %v3095_v18 = vld [vmem:[%s3921_s1 + $0xe0] sm:$0xff] (!%p163_p2)   ;;  %v3099_v22 = vld [vmem:[%s3921_s1 + $0xe8] sm:$0xff] (!%p163_p2)  }
   0xc   : > { %2072 = vmatprep.subr.bf16.mxu0 (!%p163_p2), %v3085_v8  ;;  %v3092_v15 = vld [vmem:[%s3921_s1 + $0x98] sm:$0xff] (!%p163_p2)   ;;  %v3096_v19 = vld [vmem:[%s3921_s1 + $0xa0] sm:$0xff] (!%p163_p2)   ;;  %v3100_v23 = vld [vmem:[%s3921_s1 + $0xa8] sm:$0xff] (!%p163_p2)  }
   0xd   : > { %2093 = vmatpush3.bf16.msra.mxu1 %v3084_v7  ;;  %s3952_s16 = smov (!%p187_p3, %s2013_s16), 1  ;;  %v3101_v24 = vld [vmem:[%s3921_s1 + $0x70] sm:$0xff]   ;;  %v3105_v28 = vld [vmem:[%s3921_s1 + $0x78] sm:$0xff]   ;;  %v3114_v39 = vld [vmem:[%s3921_s1 + $0x100] sm:$0xff]  }
   0xe   : > { %2094 = vmatprep.subr.bf16.mxu1 %v3087_v10  ;;  %s3065_s19 = smul.u32 20, %s3952_s16  ;;  %v3102_v25 = vld [vmem:[%s3921_s1 + $0x30] sm:$0xff]   ;;  %v3106_v29 = vld [vmem:[%s3921_s1 + $0x38] sm:$0xff]   ;;  %v3115_v40 = vld [vmem:[%s3921_s1 + $0x108] sm:$0xff]   ;;  %s2019_s9 = sshll.u32 %s3952_s16, 3 }
   0xf   : > { %2073 = vmatpush3.bf16.msra.mxu0 %v3086_v9  ;;  %v3103_v26 = vld [vmem:[%s3921_s1 + $0xf0] sm:$0xff]   ;;  %v3107_v30 = vld [vmem:[%s3921_s1 + $0xf8] sm:$0xff]   ;;  %v3118_v43 = vld [vmem:[%s3921_s1 + $0x120] sm:$0x3f]   ;;  %s195_s14 = scalar_lea.vmem %s3924_s4, %s2019_s9 }
  0x10   : > { %2074 = vmatprep.subr.bf16.mxu0 %v3089_v12  ;;  %v3104_v27 = vld [vmem:[%s3921_s1 + $0xb0] sm:$0xff]   ;;  %s3262_s30 = scalar_lea.vmem %s3920_s0, %s3065_s19  ;;  %v3111_v34 = vld [vmem:[%s3921_s1 + $0xb8] sm:$0xff]   ;;  %v523_v44 = vsel %vm521_vm1, %v3118_v43, 0  ;;  %v645_v46 = vld [vmem:[%s3922_s2] sm:$0xff] }
  0x11   : > { %2095 = vmatpush3.bf16.msra.mxu1 %v3088_v11  ;;  %v197_v31 = vld [vmem:[%s3262_s30] sm:$0xff]  ;;  %v198_v36 = vld [vmem:[%s3262_s30 + $0x8] sm:$0xff]  ;;  %v3116_v41 = vld [vmem:[%s3921_s1 + $0x110] sm:$0xff]   ;;  %v662_v48 = vand.u32 4294901760, %v645_v46 }
  0x12   : > { %2096 = vmatprep.subr.bf16.mxu1 %v3091_v14  ;;  %v2021_v32 = vcombine.low %v197_v31, %v197_v31  ;;  %v2022_v33 = vcombine.high %v197_v31, %v197_v31  ;;  %v2023_v37 = vcombine.low %v198_v36, %v198_v36  ;;  %v2024_v38 = vcombine.high %v198_v36, %v198_v36  ;;  %v3117_v42 = vld [vmem:[%s3921_s1 + $0x118] sm:$0xff]   ;;  %v3110_v45 = vld [vmem:[%s3262_s30 + $0x10] ss:$0 sps:$4 sm:$0xff]   ;;  %v646_v47 = vld [vmem:[%s3922_s2 + $0x8] sm:$0xff] }
  0x13   : > { %2075 = vmatpush3.bf16.msra.mxu0 %v3090_v13  ;;  %v665_v49 = vand.u32 4294901760, %v646_v47  ;;  %v3314_v52 = vld [vmem:[%s3922_s2 + $0x10] sm:$0xff]  ;;  %v3319_v53 = vld [vmem:[%s3922_s2 + $0x18] sm:$0xff]  ;;  %v3337_v57 = vld [vmem:[%s3922_s2 + $0x20] sm:$0xff] }
  0x14   : > { %2076 = vmatprep.subr.bf16.mxu0 %v3093_v16  ;;  %557 = vmatprep.mubr.bf16.mxu0 %v2022_v33  ;;  %v668_v54 = vand.u32 4294901760, %v3314_v52  ;;  %v671_v55 = vand.u32 4294901760, %v3319_v53  ;;  %v3342_v58 = vld [vmem:[%s3922_s2 + $0x28] sm:$0xff]  ;;  %v3347_v59 = vld [vmem:[%s3922_s2 + $0x30] sm:$0xff]  ;;  %v674_v60 = vand.u32 4294901760, %v3337_v57  ;;  %v3355_v62 = vld [vmem:[%s3922_s2 + $0x38] sm:$0xff] }
  0x15   : > { %2097 = vmatpush3.bf16.msra.mxu1 %v3092_v15  ;;  %597 = vmatprep.mubr.bf16.mxu1 %v2024_v38  ;;  %v3308_v50 = vpack.c.bf16 %v665_v49, %v662_v48  ;;  %v677_v61 = vand.u32 4294901760, %v3342_v58  ;;  %v680_v63 = vand.u32 4294901760, %v3347_v59  ;;  %v683_v0 = vand.u32 4294901760, %v3355_v62  ;;  %v3364_v1 = vld [vmem:[%s3922_s2 + $0x40] sm:$0xff]  ;;  %v3369_v2 = vld [vmem:[%s3922_s2 + $0x48] sm:$0xff]  ;;  %v3403_v8 = vld [vmem:[%s3922_s2 + $0x50] sm:$0xff] }
  0x16   : > { %2098 = vmatprep.subr.bf16.mxu1 %v3095_v18  ;;  %v3332_v56 = vpack.c.bf16 %v671_v55, %v668_v54  ;;  %v686_v5 = vand.u32 4294901760, %v3364_v1  ;;  %v689_v6 = vand.u32 4294901760, %v3369_v2  ;;  %v3408_v9 = vld [vmem:[%s3922_s2 + $0x58] sm:$0xff]  ;;  %v692_v10 = vand.u32 4294901760, %v3403_v8  ;;  %v3425_v13 = vld [vmem:[%s3922_s2 + $0x60] sm:$0xff]  ;;  %v3430_v14 = vld [vmem:[%s3922_s2 + $0x68] sm:$0xff] }
  0x17   : > { %2077 = vmatpush3.bf16.msra.mxu0 %v3094_v17  ;;  %v3376_v3 = vpack.c.bf16 %v677_v61, %v674_v60  ;;  %v3383_v4 = vpack.c.bf16 %v683_v0, %v680_v63  ;;  %v695_v11 = vand.u32 4294901760, %v3408_v9  ;;  %v698_v15 = vand.u32 4294901760, %v3425_v13 }
  0x18   : > { %2078 = vmatprep.subr.bf16.mxu0 %v3097_v20  ;;  %v3395_v7 = vpack.c.bf16 %v689_v6, %v686_v5  ;;  %v701_v16 = vand.u32 4294901760, %v3430_v14  ;;  %v3444_v18 = vsub.f32 %v645_v46, %v662_v48  ;;  %v3451_v20 = vld [vmem:[%s3922_s2 + $0x70] sm:$0xff]  ;;  %v3525_v48 = vsub.f32 %v3347_v59, %v680_v63 }
  0x19   : > { %2099 = vmatpush3.bf16.msra.mxu1 %v3096_v19  ;;  %v3420_v12 = vpack.c.bf16 %v695_v11, %v692_v10  ;;  %v3446_v19 = vsub.f32 %v646_v47, %v665_v49  ;;  %v3530_v49 = vsub.f32 %v3355_v62, %v683_v0  ;;  %v3542_v59 = vsub.f32 %v3364_v1, %v686_v5 }
  0x1a   : > { %2100 = vmatprep.subr.bf16.mxu1 %v3099_v22  ;;  %v3442_v17 = vpack.c.bf16 %v701_v16, %v698_v15  ;;  %v704_v22 = vand.u32 4294901760, %v3451_v20 }
  0x1b   : > { %2079 = vmatpush3.bf16.msra.mxu0 %v3098_v21  ;;  %v3456_v21 = vld [vmem:[%s3922_s2 + $0x78] sm:$0xff]  ;;  %v3932_v63 = vand.u32 4294901760, %v3542_v59 }
  0x1c   : > { %2080 = vmatprep.subr.bf16.mxu0 %v3101_v24  ;;  %v755_v24 = vand.u32 4294901760, %v3444_v18 }
  0x1d   : > { %2101 = vmatpush3.bf16.msra.mxu1 %v3100_v23  ;;  %v707_v23 = vand.u32 4294901760, %v3456_v21  ;;  %v812_v1 = vsub.f32 %v3542_v59, %v3932_v63 }
  0x1e   : > { %2102 = vmatprep.subr.bf16.mxu1 %v3103_v26 }
  0x1f   : > { %2081 = vmatpush3.bf16.msra.mxu0 %v3102_v25  ;;  %v762_v25 = vand.u32 4294901760, %v3446_v19  ;;  %v3470_v26 = vpack.c.bf16 %v707_v23, %v704_v22 }
  0x20   : > { %2082 = vmatprep.subr.bf16.mxu0 %v3105_v28 }
  0x21   : > { %2103 = vmatpush3.bf16.msra.mxu1 %v3104_v27  ;;  %v756_v27 = vsub.f32 %v3444_v18, %v755_v24  ;;  %v763_v28 = vsub.f32 %v3446_v19, %v762_v25 }
  0x22   : > { %2104 = vmatprep.subr.bf16.mxu1 %v3107_v30  ;;  %v3486_v30 = vsub.f32 %v3319_v53, %v671_v55  ;;  %v3933_v55 = vand.u32 4294901760, %v3530_v49 }
  0x23   : > { %2083 = vmatpush3.bf16.msra.mxu0 %v3106_v29  ;;  %v3481_v29 = vsub.f32 %v3314_v52, %v668_v54  ;;  %v757_v31 = vand.u32 4294901760, %v756_v27  ;;  %v3934_v54 = vand.u32 4294901760, %v3525_v48 }
  0x24   : > { %2322 = vmatprep.subr.bf16.mxu0 %v3129_v35 }
  0x25   : > { %2105 = vmatpush3.bf16.msra.mxu1 %v3111_v34  ;;  %v769_v33 = vand.u32 4294901760, %v3481_v29  ;;  %v3937_v34 = vand.u32 4294901760, %v3486_v30 }
  0x26   : > { %558 = vmatmul.mubr.bf16.vlgmr.msra.gmra.mrb[0].mxu0 %v2021_v32  ;;  %2756 = vmatprep.subr.bf16.mxu1 %v3131_v51  ;;  %v764_v32 = vand.u32 4294901760, %v763_v28 }
  0x27   : > { %2323 = vmatpush3.bf16.msra.mxu0 %v3114_v39  ;;  %2332 = vmatprep.mubr.msk.bf16.mxu0 %vm3130_vm0, %v3129_v35  ;;  %v777_v38 = vsub.f32 %v3486_v30, %v3937_v34  ;;  %v3505_v39 = vsub.f32 %v3337_v57, %v674_v60  ;;  %v3547_v60 = vsub.f32 %v3369_v2, %v689_v6 }
  0x28   : > { %598 = vmatmul.mubr.bf16.vlgmr.msra.gmra.mrb[0].mxu1 %v2023_v37  ;;  %2324 = vmatprep.subr.bf16.mxu0 %v3129_v35  ;;  %v3494_v36 = vpack.c.bf16 %v764_v32, %v757_v31  ;;  %v770_v37 = vsub.f32 %v3481_v29, %v769_v33  ;;  %v3563_v2 = vsub.f32 %v3403_v8, %v692_v10  ;;  %v813_v31 = vand.u32 4294901760, %v812_v1 }
  0x29   : > { %2368 = vmatprep.mubr.msk.f32.mxu1 %vm3130_vm0, %v3129_v35  ;;  %2758 = vmatpush3.bf16.msra.mxu1 %v3308_v50  ;;  %v3936_v43 = vand.u32 4294901760, %v3505_v39  ;;  %v3931_v0 = vand.u32 4294901760, %v3547_v60  ;;  %v3568_v6 = vsub.f32 %v3408_v9, %v695_v11  ;;  %v3585_v9 = vsub.f32 %v3425_v13, %v698_v15 }
  0x2a   : > { %2759 = vmatprep.subr.bf16.mxu1 %v3131_v51  ;;  %v3590_v11 = vsub.f32 %v3430_v14, %v701_v16  ;;  %v3602_v13 = vsub.f32 %v3451_v20, %v704_v22  ;;  %v3607_v14 = vsub.f32 %v3456_v21, %v707_v23 }
  0x2b   : > { %2325 = vmatpush3.bf16.msra.mxu0 %v3115_v40  ;;  %v3510_v40 = vsub.f32 %v3342_v58, %v677_v61  ;;  %v784_v46 = vsub.f32 %v3505_v39, %v3936_v43  ;;  %v798_v58 = vsub.f32 %v3525_v48, %v3934_v54  ;;  %v805_v61 = vsub.f32 %v3530_v49, %v3933_v55 }
  0x2c   : > { %2326 = vmatprep.subr.bf16.mxu0 %v3129_v35  ;;  %v819_v5 = vsub.f32 %v3547_v60, %v3931_v0 }
  0x2d   : > { %2761 = vmatpush3.bf16.msra.mxu1 %v3332_v56  ;;  %v785_v52 = vand.u32 4294901760, %v784_v46  ;;  %v799_v62 = vand.u32 4294901760, %v798_v58  ;;  %v806_v27 = vand.u32 4294901760, %v805_v61  ;;  %v3926_v61 = vand.u32 4294901760, %v3602_v13 }
  0x2e   : > { %2762 = vmatprep.subr.bf16.mxu1 %v3131_v51  ;;  %v820_v32 = vand.u32 4294901760, %v819_v5 }
  0x2f   : > { %2327 = vmatpush3.bf16.msra.mxu0 %v3116_v41  ;;  %v771_v41 = vand.u32 4294901760, %v770_v37  ;;  %v3570_v28 = vpack.c.bf16 %v806_v27, %v799_v62  ;;  %v3930_v37 = vand.u32 4294901760, %v3563_v2  ;;  %v3925_v62 = vand.u32 4294901760, %v3607_v14 }
  0x30   : > { %2328 = vmatprep.subr.bf16.mxu0 %v3129_v35  ;;  %v854_v20 = vsub.f32 %v3602_v13, %v3926_v61 }
  0x31   : > { %2764 = vmatpush3.bf16.msra.mxu1 %v3376_v3  ;;  %v826_v8 = vsub.f32 %v3563_v2, %v3930_v37  ;;  %v861_v22 = vsub.f32 %v3607_v14, %v3925_v62 }
  0x32   : > { %2765 = vmatprep.subr.bf16.mxu1 %v3131_v51  ;;  %v855_v23 = vand.u32 4294901760, %v854_v20 }
  0x33   : > { %2329 = vmatpush3.bf16.msra.mxu0 %v3117_v42  ;;  %v778_v42 = vand.u32 4294901760, %v777_v38  ;;  %v3929_v38 = vand.u32 4294901760, %v3568_v6  ;;  %v862_v1 = vand.u32 4294901760, %v861_v22 }
  0x34   : > { %2330 = vmatprep.subr.bf16.mxu0 %v3129_v35 }
  0x35   : > { %2767 = vmatpush3.bf16.msra.mxu1 %v3383_v4  ;;  %v833_v10 = vsub.f32 %v3568_v6, %v3929_v38  ;;  %v3622_v5 = vpack.c.bf16 %v862_v1, %v855_v23 }
  0x36   : > { %2768 = vmatprep.subr.bf16.mxu1 %v3131_v51 }
  0x37   : > { %2331 = vmatpush3.bf16.msra.mxu0 %v523_v44  ;;  %v3935_v44 = vand.u32 4294901760, %v3510_v40  ;;  %v834_v46 = vand.u32 4294901760, %v833_v10  ;;  %v3638_v10 = vpack.c.bf16 %v3530_v49, %v3525_v48 }
  0x38   : > { %2900 = vmatprep.subr.bf16.mxu0 %v3131_v51 }
  0x39   : > { %2770 = vmatpush3.bf16.msra.mxu1 %v3395_v7  ;;  %v791_v47 = vsub.f32 %v3510_v40, %v3935_v44 }
  0x3a   : > { %2333 = vmatmul.mubr.msk.bf16.vlgmr.msra.gmra.mrb[4].mxu0 %vm517_vm2, %v3110_v45  ;;  %2771 = vmatprep.subr.bf16.mxu1 %v3131_v51  ;;  %v3514_v45 = vpack.c.bf16 %v778_v42, %v771_v41  ;;  %v3574_v41 = vpack.c.bf16 %v820_v32, %v813_v31  ;;  %v827_v42 = vand.u32 4294901760, %v826_v8  ;;  %v3626_v31 = vpack.c.bf16 %v3446_v19, %v3444_v18 }
  0x3b   : > { %2578 = vmatprep.mubr.msk.f32.mxu0 %vm3130_vm0, %v3129_v35  ;;  %2902 = vmatpush3.bf16.msra.mxu0 %v3308_v50  ;;  %v792_v53 = vand.u32 4294901760, %v791_v47  ;;  %v3928_v47 = vand.u32 4294901760, %v3585_v9  ;;  %v3630_v32 = vpack.c.bf16 %v3486_v30, %v3481_v29  ;;  %v3634_v8 = vpack.c.bf16 %v3510_v40, %v3505_v39 }
  0x3c   : > { %2903 = vmatprep.subr.bf16.mxu0 %v3131_v51  ;;  %v3939_v18 = vand.u32 4294901760, %v3505_v39  ;;  %v3940_v19 = vand.u32 4294901760, %v3510_v40  ;;  %v3942_v29 = vand.u32 4294901760, %v3530_v49  ;;  %v3944_v39 = vand.u32 4294901760, %v3547_v60 }
  0x3d   : > { %2773 = vmatpush3.bf16.msra.mxu1 %v3420_v12  ;;  %v3534_v57 = vpack.c.bf16 %v792_v53, %v785_v52  ;;  %v3927_v52 = vand.u32 4294901760, %v3590_v11  ;;  %v3594_v53 = vpack.c.bf16 %v834_v46, %v827_v42  ;;  %v840_v58 = vsub.f32 %v3585_v9, %v3928_v47 }
  0x3e   : > { %2774 = vmatprep.subr.bf16.mxu1 %v3131_v51  ;;  %v3642_v42 = vpack.c.bf16 %v3547_v60, %v3542_v59  ;;  %v3646_v46 = vpack.c.bf16 %v3568_v6, %v3563_v2  ;;  %v3946_v49 = vand.u32 4294901760, %v3568_v6  ;;  %v3948_v60 = vand.u32 4294901760, %v3590_v11 }
  0x3f   : > { %2905 = vmatpush3.bf16.msra.mxu0 %v3332_v56  ;;  %v847_v15 = vsub.f32 %v3590_v11, %v3927_v52  ;;  %v841_v16 = vand.u32 4294901760, %v840_v58  ;;  %v3650_v58 = vpack.c.bf16 %v3590_v11, %v3585_v9  ;;  %v3950_v6 = vand.u32 4294901760, %v3607_v14 }
  0x40   : > { %2906 = vmatprep.subr.bf16.mxu0 %v3131_v51 }
  0x41   : > { %2776 = vmatpush3.bf16.msra.mxu1 %v3442_v17  ;;  %v848_v27 = vand.u32 4294901760, %v847_v15  ;;  %v3654_v15 = vpack.c.bf16 %v3607_v14, %v3602_v13 }
  0x42   : > { %2777 = vmatprep.subr.bf16.mxu1 %v3131_v51 }
  0x43   : > { %2908 = vmatpush3.bf16.msra.mxu0 %v3376_v3  ;;  %v3620_v21 = vpack.c.bf16 %v848_v27, %v841_v16  ;;  %v2020_v27 = vld [vmem:[%s3923_s3] ss:$0 sm:$0xff] }
  0x44   : > { %2909 = vmatprep.subr.bf16.mxu0 %v3131_v51 }
  0x45   : > { %2779 = vmatpush3.bf16.msra.mxu1 %v3470_v26 }
  0x46   : > { %2780 = vmatprep.subr.bf16.mxu1 %v3131_v51 }
  0x47   : > { %2911 = vmatpush3.bf16.msra.mxu0 %v3383_v4 }
  0x48   : > { %2912 = vmatprep.subr.bf16.mxu0 %v3131_v51 }
  0x4b   : > { %2914 = vmatpush3.bf16.msra.mxu0 %v3395_v7 }
  0x4c   : > { %2915 = vmatprep.subr.bf16.mxu0 %v3131_v51 }
  0x4f   : > { %2917 = vmatpush3.bf16.msra.mxu0 %v3420_v12 }
  0x50   : > { %2918 = vmatprep.subr.bf16.mxu0 %v3131_v51 }
  0x53   : > { %2920 = vmatpush3.bf16.msra.mxu0 %v3442_v17 }
  0x54   : > { %2921 = vmatprep.subr.bf16.mxu0 %v3131_v51 }
  0x57   : > { %2923 = vmatpush3.bf16.msra.mxu0 %v3470_v26 }
  0x58   : > { %2924 = vmatprep.subr.bf16.mxu0 %v3131_v51 }
  0xf9   : > { %v2084_v16 = vpop.f32.mrb[0].mxu0 }
  0xfa   : > { %v2085_v20 = vpop.f32.mrb[1].mxu0 }
  0xfb   : > { %v2086_v22 = vadd.f32 %v2085_v20, %v2084_v16  ;;  %v2087_v23 = vpop.f32.mrb[2].mxu0  ;;  %v2106_v1 = vpop.f32.mrb[0].mxu1 }
  0xfc   : > { %v2088_v62 = vpop.f32.mrb[3].mxu0  ;;  %v2107_v61 = vpop.f32.mrb[1].mxu1 }
  0xfd   : > { %v560_v52 = vadd.f32 %v2086_v22, %v2020_v27  ;;  %v2108_v47 = vadd.f32 %v2107_v61, %v2106_v1  ;;  %v2109_v38 = vpop.f32.mrb[2].mxu1 }
  0xfe   : > { %v2110_v37 = vpop.f32.mrb[3].mxu1 }
  0xff   : > { %v600_v0 = vadd.f32 %v2108_v47, %v560_v52 }
 0x10d   : > { %v639_v63 = vpop.f32.mrb[4].mxu0 }
 0x10e   : > { %v3659_v55 = vadd.f32 %v639_v63, %v600_v0  ;;  %v2334_v54 = vpop.f32.mrb[5].mxu0 }
 0x10f   : > { %v642_v44 = vpop.f32.mrb[6].mxu0 }
 0x110   : > { %v3662_v43 = vand.u32 4294901760, %v3659_v55  ;;  %v2335_v34 = vpop.f32.mrb[7].mxu0  ;;  %v3938_v44 = vand.u32 4294901760, %v3486_v30 }
 0x111   : > { %v3724_v34 = vpack.c.bf16 %v762_v25, %v755_v24  ;;  %v3742_v24 = vpack.c.bf16 %v3940_v19, %v3939_v18  ;;  %v3941_v25 = vand.u32 4294901760, %v3525_v48  ;;  %v3945_v48 = vand.u32 4294901760, %v3563_v2 }
 0x112   : > { %v743_v16 = vsub.f32 %v3659_v55, %v3662_v43  ;;  %v3732_v54 = vpack.c.bf16 %v3938_v44, %v769_v33  ;;  %v3943_v33 = vand.u32 4294901760, %v3542_v59  ;;  %v3947_v59 = vand.u32 4294901760, %v3585_v9 }
 0x113   : > { %v3750_v30 = vpack.c.bf16 %v3942_v29, %v3941_v25  ;;  %v3766_v63 = vpack.c.bf16 %v3946_v49, %v3945_v48  ;;  %v3949_v2 = vand.u32 4294901760, %v3602_v13 }
 0x114   : > { %v744_v20 = vand.u32 4294901760, %v743_v16  ;;  %v3758_v40 = vpack.c.bf16 %v3944_v39, %v3943_v33  ;;  %v3774_v0 = vpack.c.bf16 %v3948_v60, %v3947_v59 }
 0x115   : > { %v3782_v37 = vpack.c.bf16 %v3950_v6, %v3949_v2 }
 0x116   : > { %v745_v62 = vsub.f32 %v743_v16, %v744_v20 }
 0x118   : > { %v746_v23 = vand.u32 4294901760, %v745_v62 }
 0x11a   : > { %2369 = vmatmul.mubr.f32.vlgmr.msra.gmra.mrb[4].mxu1 %v746_v23 }
 0x11b   : > { %2782 = vmatpush3.bf16.msra.mxu1 %v3494_v36  ;;  %2403 = vmatprep.mubr.msk.f32.mxu1 %vm3130_vm0, %v3129_v35 }
 0x11c   : > { %2783 = vmatprep.subr.bf16.mxu1 %v3131_v51 }
 0x11f   : > { %2785 = vmatpush3.bf16.msra.mxu1 %v3514_v45 }
 0x120   : > { %2786 = vmatprep.subr.bf16.mxu1 %v3131_v51 }
 0x123   : > { %2788 = vmatpush3.bf16.msra.mxu1 %v3534_v57 }
 0x124   : > { %2789 = vmatprep.subr.bf16.mxu1 %v3131_v51 }
 0x127   : > { %2791 = vmatpush3.bf16.msra.mxu1 %v3570_v28 }
 0x128   : > { %2792 = vmatprep.subr.bf16.mxu1 %v3131_v51 }
 0x12b   : > { %2794 = vmatpush3.bf16.msra.mxu1 %v3574_v41 }
 0x12c   : > { %2795 = vmatprep.subr.bf16.mxu1 %v3131_v51 }
 0x12f   : > { %2797 = vmatpush3.bf16.msra.mxu1 %v3594_v53 }
 0x130   : > { %2798 = vmatprep.subr.bf16.mxu1 %v3131_v51 }
 0x133   : > { %2800 = vmatpush3.bf16.msra.mxu1 %v3620_v21 }
 0x134   : > { %2801 = vmatprep.subr.bf16.mxu1 %v3131_v51 }
 0x137   : > { %2803 = vmatpush3.bf16.msra.mxu1 %v3622_v5 }
 0x138   : > { %2804 = vmatprep.subr.bf16.mxu1 %v3131_v51 }
 0x13a   : > { %2404 = vmatmul.mubr.f32.vlgmr.msra.gmra.mrb[4].mxu1 %v3662_v43 }
 0x13b   : > { %2806 = vmatpush3.bf16.msra.mxu1 %v3626_v31  ;;  %2438 = vmatprep.mubr.msk.f32.mxu1 %vm3130_vm0, %v3129_v35 }
 0x13c   : > { %2807 = vmatprep.subr.bf16.mxu1 %v3131_v51 }
 0x13f   : > { %2809 = vmatpush3.bf16.msra.mxu1 %v3630_v32 }
 0x140   : > { %2810 = vmatprep.subr.bf16.mxu1 %v3131_v51 }
 0x143   : > { %2812 = vmatpush3.bf16.msra.mxu1 %v3634_v8 }
 0x144   : > { %2813 = vmatprep.subr.bf16.mxu1 %v3131_v51 }
 0x147   : > { %2815 = vmatpush3.bf16.msra.mxu1 %v3638_v10 }
 0x148   : > { %2816 = vmatprep.subr.bf16.mxu1 %v3131_v51 }
 0x14b   : > { %2818 = vmatpush3.bf16.msra.mxu1 %v3642_v42 }
 0x14c   : > { %2819 = vmatprep.subr.bf16.mxu1 %v3131_v51 }
 0x14f   : > { %2821 = vmatpush3.bf16.msra.mxu1 %v3646_v46 }
 0x150   : > { %2822 = vmatprep.subr.bf16.mxu1 %v3131_v51 }
 0x153   : > { %2824 = vmatpush3.bf16.msra.mxu1 %v3650_v58 }
 0x154   : > { %2825 = vmatprep.subr.bf16.mxu1 %v3131_v51 }
 0x157   : > { %2827 = vmatpush3.bf16.msra.mxu1 %v3654_v15 }
 0x158   : > { %2828 = vmatprep.subr.bf16.mxu1 %v3131_v51 }
 0x15a   : > { %2439 = vmatmul.mubr.f32.vlgmr.msra.gmra.mrb[4].mxu1 %v743_v16 }
 0x15b   : > { %2830 = vmatpush3.bf16.msra.mxu1 %v3308_v50  ;;  %2473 = vmatprep.mubr.msk.f32.mxu1 %vm3130_vm0, %v3129_v35 }
 0x15c   : > { %2831 = vmatprep.subr.bf16.mxu1 %v3131_v51 }
 0x15f   : > { %2833 = vmatpush3.bf16.msra.mxu1 %v3332_v56 }
 0x160   : > { %2834 = vmatprep.subr.bf16.mxu1 %v3131_v51 }
 0x163   : > { %2836 = vmatpush3.bf16.msra.mxu1 %v3376_v3 }
 0x164   : > { %2837 = vmatprep.subr.bf16.mxu1 %v3131_v51 }
 0x167   : > { %2839 = vmatpush3.bf16.msra.mxu1 %v3383_v4 }
 0x168   : > { %2840 = vmatprep.subr.bf16.mxu1 %v3131_v51 }
 0x16b   : > { %2842 = vmatpush3.bf16.msra.mxu1 %v3395_v7 }
 0x16c   : > { %2843 = vmatprep.subr.bf16.mxu1 %v3131_v51 }
 0x16f   : > { %2845 = vmatpush3.bf16.msra.mxu1 %v3420_v12 }
 0x170   : > { %2846 = vmatprep.subr.bf16.mxu1 %v3131_v51 }
 0x173   : > { %2848 = vmatpush3.bf16.msra.mxu1 %v3442_v17 }
 0x174   : > { %2849 = vmatprep.subr.bf16.mxu1 %v3131_v51 }
 0x177   : > { %2851 = vmatpush3.bf16.msra.mxu1 %v3470_v26 }
 0x178   : > { %2852 = vmatprep.subr.bf16.mxu1 %v3131_v51 }
 0x17a   : > { %2474 = vmatmul.mubr.f32.vlgmr.msra.gmra.mrb[4].mxu1 %v744_v20 }
 0x17b   : > { %2854 = vmatpush3.bf16.msra.mxu1 %v3724_v34  ;;  %2508 = vmatprep.mubr.msk.f32.mxu1 %vm3130_vm0, %v3129_v35 }
 0x17c   : > { %2855 = vmatprep.subr.bf16.mxu1 %v3131_v51 }
 0x17f   : > { %2857 = vmatpush3.bf16.msra.mxu1 %v3732_v54 }
 0x180   : > { %2858 = vmatprep.subr.bf16.mxu1 %v3131_v51 }
 0x183   : > { %2860 = vmatpush3.bf16.msra.mxu1 %v3742_v24 }
 0x184   : > { %2861 = vmatprep.subr.bf16.mxu1 %v3131_v51 }
 0x187   : > { %2863 = vmatpush3.bf16.msra.mxu1 %v3750_v30 }
 0x188   : > { %2864 = vmatprep.subr.bf16.mxu1 %v3131_v51 }
 0x18b   : > { %2866 = vmatpush3.bf16.msra.mxu1 %v3758_v40 }
 0x18c   : > { %2867 = vmatprep.subr.bf16.mxu1 %v3131_v51 }
 0x18f   : > { %2869 = vmatpush3.bf16.msra.mxu1 %v3766_v63 }
 0x190   : > { %2870 = vmatprep.subr.bf16.mxu1 %v3131_v51 }
 0x193   : > { %2872 = vmatpush3.bf16.msra.mxu1 %v3774_v0 }
 0x194   : > { %2873 = vmatprep.subr.bf16.mxu1 %v3131_v51 }
 0x197   : > { %2875 = vmatpush3.bf16.msra.mxu1 %v3782_v37 }
 0x198   : > { %2876 = vmatprep.subr.bf16.mxu1 %v3131_v51 }
 0x19a   : > { %2509 = vmatmul.mubr.f32.vlgmr.msra.gmra.mrb[4].mxu1 %v3662_v43 }
 0x19b   : > { %2878 = vmatpush3.bf16.msra.mxu1 %v3308_v50  ;;  %2543 = vmatprep.mubr.msk.f32.mxu1 %vm3130_vm0, %v3129_v35 }
 0x19c   : > { %2879 = vmatprep.subr.bf16.mxu1 %v3131_v51 }
 0x19f   : > { %2881 = vmatpush3.bf16.msra.mxu1 %v3332_v56 }
 0x1a0   : > { %2882 = vmatprep.subr.bf16.mxu1 %v3131_v51 }
 0x1a3   : > { %2884 = vmatpush3.bf16.msra.mxu1 %v3376_v3 }
 0x1a4   : > { %2885 = vmatprep.subr.bf16.mxu1 %v3131_v51 }
 0x1a7   : > { %2887 = vmatpush3.bf16.msra.mxu1 %v3383_v4 }
 0x1a8   : > { %2888 = vmatprep.subr.bf16.mxu1 %v3131_v51 }
 0x1ab   : > { %2890 = vmatpush3.bf16.msra.mxu1 %v3395_v7 }
 0x1ac   : > { %2891 = vmatprep.subr.bf16.mxu1 %v3131_v51 }
 0x1af   : > { %2893 = vmatpush3.bf16.msra.mxu1 %v3420_v12 }
 0x1b0   : > { %2894 = vmatprep.subr.bf16.mxu1 %v3131_v51 }
 0x1b3   : > { %2896 = vmatpush3.bf16.msra.mxu1 %v3442_v17 }
 0x1b4   : > { %2897 = vmatprep.subr.bf16.mxu1 %v3131_v51 }
 0x1b7   : > { %2899 = vmatpush3.bf16.msra.mxu1 %v3470_v26 }
 0x1ba   : > { %2544 = vmatmul.mubr.f32.vlgmr.msra.gmra.mrb[4].mxu1 %v3662_v43 }
 0x28d   : > { %v1298_v38 = vpop.f32.mrb[4].mxu1 }
 0x28e   : > { %v3807_v9 = vsub.f32 %v3659_v55, %v1298_v38  ;;  %v2545_v11 = vpop.f32.mrb[5].mxu1 }
 0x290   : > { %v1303_v47 = vmul.f32 %v3807_v9, %v3807_v9 }
 0x292   : > { %v3811_v52 = vand.u32 4294901760, %v1303_v47 }
 0x294   : > { %v1387_v13 = vsub.f32 %v1303_v47, %v3811_v52 }
 0x296   : > { %v1388_v14 = vand.u32 4294901760, %v1387_v13 }
 0x298   : > { %v1389_v61 = vsub.f32 %v1387_v13, %v1388_v14 }
 0x29a   : > { %v1390_v27 = vand.u32 4294901760, %v1389_v61 }
 0x29c   : > { %2579 = vmatmul.mubr.f32.vlgmr.msra.gmra.mrb[8].mxu0 %v1390_v27 }
 0x29d   : > { %2926 = vmatpush3.bf16.msra.mxu0 %v3494_v36  ;;  %2613 = vmatprep.mubr.msk.f32.mxu0 %vm3130_vm0, %v3129_v35 }
 0x29e   : > { %2927 = vmatprep.subr.bf16.mxu0 %v3131_v51 }
 0x2a1   : > { %2929 = vmatpush3.bf16.msra.mxu0 %v3514_v45 }
 0x2a2   : > { %2930 = vmatprep.subr.bf16.mxu0 %v3131_v51 }
 0x2a5   : > { %2932 = vmatpush3.bf16.msra.mxu0 %v3534_v57 }
 0x2a6   : > { %2933 = vmatprep.subr.bf16.mxu0 %v3131_v51 }
 0x2a9   : > { %2935 = vmatpush3.bf16.msra.mxu0 %v3570_v28 }
 0x2aa   : > { %2936 = vmatprep.subr.bf16.mxu0 %v3131_v51 }
 0x2ad   : > { %2938 = vmatpush3.bf16.msra.mxu0 %v3574_v41 }
 0x2ae   : > { %2939 = vmatprep.subr.bf16.mxu0 %v3131_v51 }
 0x2b1   : > { %2941 = vmatpush3.bf16.msra.mxu0 %v3594_v53 }
 0x2b2   : > { %2942 = vmatprep.subr.bf16.mxu0 %v3131_v51 }
 0x2b5   : > { %2944 = vmatpush3.bf16.msra.mxu0 %v3620_v21 }
 0x2b6   : > { %2945 = vmatprep.subr.bf16.mxu0 %v3131_v51 }
 0x2b9   : > { %2947 = vmatpush3.bf16.msra.mxu0 %v3622_v5 }
 0x2ba   : > { %2948 = vmatprep.subr.bf16.mxu0 %v3131_v51 }
 0x2bc   : > { %2614 = vmatmul.mubr.f32.vlgmr.msra.gmra.mrb[8].mxu0 %v3811_v52 }
 0x2bd   : > { %2950 = vmatpush3.bf16.msra.mxu0 %v3626_v31  ;;  %2648 = vmatprep.mubr.msk.f32.mxu0 %vm3130_vm0, %v3129_v35 }
 0x2be   : > { %2951 = vmatprep.subr.bf16.mxu0 %v3131_v51 }
 0x2c1   : > { %2953 = vmatpush3.bf16.msra.mxu0 %v3630_v32 }
 0x2c2   : > { %2954 = vmatprep.subr.bf16.mxu0 %v3131_v51 }
 0x2c5   : > { %2956 = vmatpush3.bf16.msra.mxu0 %v3634_v8 }
 0x2c6   : > { %2957 = vmatprep.subr.bf16.mxu0 %v3131_v51 }
 0x2c9   : > { %2959 = vmatpush3.bf16.msra.mxu0 %v3638_v10 }
 0x2ca   : > { %2960 = vmatprep.subr.bf16.mxu0 %v3131_v51 }
 0x2cd   : > { %2962 = vmatpush3.bf16.msra.mxu0 %v3642_v42 }
 0x2ce   : > { %2963 = vmatprep.subr.bf16.mxu0 %v3131_v51 }
 0x2d1   : > { %2965 = vmatpush3.bf16.msra.mxu0 %v3646_v46 }
 0x2d2   : > { %2966 = vmatprep.subr.bf16.mxu0 %v3131_v51 }
 0x2d5   : > { %2968 = vmatpush3.bf16.msra.mxu0 %v3650_v58 }
 0x2d6   : > { %2969 = vmatprep.subr.bf16.mxu0 %v3131_v51 }
 0x2d9   : > { %2971 = vmatpush3.bf16.msra.mxu0 %v3654_v15 }
 0x2da   : > { %2972 = vmatprep.subr.bf16.mxu0 %v3131_v51 }
 0x2dc   : > { %2649 = vmatmul.mubr.f32.vlgmr.msra.gmra.mrb[8].mxu0 %v1387_v13 }
 0x2dd   : > { %2974 = vmatpush3.bf16.msra.mxu0 %v3308_v50  ;;  %2683 = vmatprep.mubr.msk.f32.mxu0 %vm3130_vm0, %v3129_v35 }
 0x2de   : > { %2975 = vmatprep.subr.bf16.mxu0 %v3131_v51 }
 0x2e1   : > { %2977 = vmatpush3.bf16.msra.mxu0 %v3332_v56 }
 0x2e2   : > { %2978 = vmatprep.subr.bf16.mxu0 %v3131_v51 }
 0x2e5   : > { %2980 = vmatpush3.bf16.msra.mxu0 %v3376_v3 }
 0x2e6   : > { %2981 = vmatprep.subr.bf16.mxu0 %v3131_v51 }
 0x2e9   : > { %2983 = vmatpush3.bf16.msra.mxu0 %v3383_v4 }
 0x2ea   : > { %2984 = vmatprep.subr.bf16.mxu0 %v3131_v51 }
 0x2ed   : > { %2986 = vmatpush3.bf16.msra.mxu0 %v3395_v7 }
 0x2ee   : > { %2987 = vmatprep.subr.bf16.mxu0 %v3131_v51 }
 0x2f1   : > { %2989 = vmatpush3.bf16.msra.mxu0 %v3420_v12 }
 0x2f2   : > { %2990 = vmatprep.subr.bf16.mxu0 %v3131_v51 }
 0x2f5   : > { %2992 = vmatpush3.bf16.msra.mxu0 %v3442_v17 }
 0x2f6   : > { %2993 = vmatprep.subr.bf16.mxu0 %v3131_v51 }
 0x2f9   : > { %2995 = vmatpush3.bf16.msra.mxu0 %v3470_v26 }
 0x2fa   : > { %2996 = vmatprep.subr.bf16.mxu0 %v3131_v51 }
 0x2fc   : > { %2684 = vmatmul.mubr.f32.vlgmr.msra.gmra.mrb[8].mxu0 %v1388_v14 }
 0x2fd   : > { %2998 = vmatpush3.bf16.msra.mxu0 %v3724_v34  ;;  %2718 = vmatprep.mubr.msk.f32.mxu0 %vm3130_vm0, %v3129_v35 }
 0x2fe   : > { %2999 = vmatprep.subr.bf16.mxu0 %v3131_v51 }
 0x301   : > { %3001 = vmatpush3.bf16.msra.mxu0 %v3732_v54 }
 0x302   : > { %3002 = vmatprep.subr.bf16.mxu0 %v3131_v51 }
 0x305   : > { %3004 = vmatpush3.bf16.msra.mxu0 %v3742_v24 }
 0x306   : > { %3005 = vmatprep.subr.bf16.mxu0 %v3131_v51 }
 0x309   : > { %3007 = vmatpush3.bf16.msra.mxu0 %v3750_v30 }
 0x30a   : > { %3008 = vmatprep.subr.bf16.mxu0 %v3131_v51 }
 0x30d   : > { %3010 = vmatpush3.bf16.msra.mxu0 %v3758_v40 }
 0x30e   : > { %3011 = vmatprep.subr.bf16.mxu0 %v3131_v51 }
 0x311   : > { %3013 = vmatpush3.bf16.msra.mxu0 %v3766_v63 }
 0x312   : > { %3014 = vmatprep.subr.bf16.mxu0 %v3131_v51 }
 0x315   : > { %3016 = vmatpush3.bf16.msra.mxu0 %v3774_v0 }
 0x316   : > { %3017 = vmatprep.subr.bf16.mxu0 %v3131_v51 }
 0x319   : > { %3019 = vmatpush3.bf16.msra.mxu0 %v3782_v37 }
 0x31a   : > { %3020 = vmatprep.subr.bf16.mxu0 %v3131_v51 }
 0x31c   : > { %2719 = vmatmul.mubr.f32.vlgmr.msra.gmra.mrb[8].mxu0 %v3811_v52 }
 0x31d   : > { %3022 = vmatpush3.bf16.msra.mxu0 %v3308_v50  ;;  %2753 = vmatprep.mubr.msk.f32.mxu0 %vm3130_vm0, %v3129_v35 }
 0x31e   : > { %3023 = vmatprep.subr.bf16.mxu0 %v3131_v51 }
 0x321   : > { %3025 = vmatpush3.bf16.msra.mxu0 %v3332_v56 }
 0x322   : > { %3026 = vmatprep.subr.bf16.mxu0 %v3131_v51 }
 0x325   : > { %3028 = vmatpush3.bf16.msra.mxu0 %v3376_v3  ;;  %v2064_v3 = vld [vmem:[%s3923_s3 + $0x1] ss:$0 sm:$0xff] }
 0x326   : > { %3029 = vmatprep.subr.bf16.mxu0 %v3131_v51 }
 0x329   : > { %3031 = vmatpush3.bf16.msra.mxu0 %v3383_v4 }
 0x32a   : > { %3032 = vmatprep.subr.bf16.mxu0 %v3131_v51 }
 0x32d   : > { %3034 = vmatpush3.bf16.msra.mxu0 %v3395_v7 }
 0x32e   : > { %3035 = vmatprep.subr.bf16.mxu0 %v3131_v51 }
 0x331   : > { %3037 = vmatpush3.bf16.msra.mxu0 %v3420_v12  ;;  %v2065_v12 = vld [vmem:[%s3923_s3 + $0x2] ss:$0 sm:$0xff] }
 0x332   : > { %3038 = vmatprep.subr.bf16.mxu0 %v3131_v51 }
 0x335   : > { %3040 = vmatpush3.bf16.msra.mxu0 %v3442_v17 }
 0x336   : > { %3041 = vmatprep.subr.bf16.mxu0 %v3131_v51 }
 0x339   : > { %3043 = vmatpush3.bf16.msra.mxu0 %v3470_v26 }
 0x33c   : > { %2754 = vmatmul.mubr.f32.vlgmr.msra.gmra.mrb[8].mxu0 %v3811_v52 }
 0x40f   : > { %v1942_v35 = vpop.f32.mrb[8].mxu0 }
 0x410   : > { %v3044_v50 = vadd.f32 1e-05, %v1942_v35  ;;  %v2755_v56 = vpop.f32.mrb[9].mxu0 }
 0x412   : > { %3119 = vrsqrt.f32 %v3044_v50 }
 0x41c   : > { %v3120_v4 = vpop.eup %3119 }
 0x41d   : > { %v1951_v7 = vmul.f32 %v3120_v4, %v2064_v3 }
 0x41f   : > { %v1952_v51 = vmul.f32 %v1951_v7, %v3807_v9 }
 0x421   : > { %v1958_v17 = vadd.f32 %v2065_v12, %v1952_v51 }
 0x423   : > { %1959 = vst [vmem:[%s195_s14] sm:$0xff] %v1958_v17 }
 0x424 PF: > { %s14_s15 = sadd.s32 1, %s3127_s15  }
 0x425   : > { %p11_p4 = scmp.ge.s32.totalorder %s14_s15, 4  }
 0x427   :  { %13 = sbr.rel (!%p11_p4) target bundleno = 1 (0x1), region = 66 }

</bundles_post_ra>
